<compile_context>
chip_gen: v6e
topology: v6e:2x2x1
jax: 0.10.0
libtpu: 0.0.40
codegen_flags: <defaults>
</compile_context>

<pallas_src>
import functools

import jax
import jax.numpy as jnp
import numpy as np
from jax.experimental import pallas as pl
from jax.experimental.pallas import tpu as pltpu

HIDDEN = 256          # fixed by the module definition
OUT_LANES = 128       # lane-dense width of the fused mu/std head matmul
HEAD_HALF = 64        # std-head columns start here inside the fused head weight
TILE_B_MAX = 2048     # ~1.6 MiB per-step footprint -> fits every TPU generation
MIN_SPLIT_B = 256     # don't split the batch across grid steps below this tile size


def _round_up(x, m):
    return (x + m - 1) // m * m


def actor_kernel(x_ref, eps_ref, w1_ref, b1_ref, w2_ref, b2_ref,
                 wh_ref, bh_ref, act_ref, logp_ref, *, action_dim, max_action):
    # ---- fc1 + relu (bf16 MXU operands, f32 accumulation) ----
    h1 = jnp.dot(x_ref[...].astype(jnp.bfloat16), w1_ref[...],
                 preferred_element_type=jnp.float32) + b1_ref[...]
    h1 = jnp.maximum(h1, 0.0)

    # ---- fc2 + relu ----
    h2 = jnp.dot(h1.astype(jnp.bfloat16), w2_ref[...],
                 preferred_element_type=jnp.float32) + b2_ref[...]
    h2 = jnp.maximum(h2, 0.0)

    # ---- fused mu/std heads: one lane-dense [HIDDEN, 128] matmul ----
    # Columns 0..A-1 hold the mu head, columns 64..64+A-1 hold the std head
    # (padding columns are exactly zero by construction in prepare_params).
    heads = jnp.dot(h2.astype(jnp.bfloat16), wh_ref[...],
                    preferred_element_type=jnp.float32) + bh_ref[...]
    mu = heads[:, :action_dim]                                   # [tb, A]
    std_pre = pltpu.roll(heads, HEAD_HALF, 1)[:, :action_dim]    # [tb, A]

    std = jnp.logaddexp(std_pre, 0.0)            # softplus, stable form
    eps = eps_ref[...]                           # [tb, A] f32 noise
    z = mu + std * eps                           # reparameterized sample
    action = jnp.tanh(z)

    # Normal(mu, std).log_prob(z): (z - mu)/std == eps exactly -> no divide.
    # The two logs (log std and the tanh change-of-variables term) are fused
    # into one: -log(std * (1 - a^2 + 1e-7)).
    log_prob = (-0.5 * (eps * eps) - 0.5 * jnp.log(2.0 * jnp.pi)
                - jnp.log(std * (1.0 - action * action + 1e-07)))

    act_ref[...] = action * max_action
    logp_ref[...] = jnp.sum(log_prob, axis=1, keepdims=True)


def prepare_params(params, action_dim):
    """One-time param prep: fuse mu/std heads into a lane-padded [HIDDEN, 128]
    weight/bias and cast MXU operands to bf16.  Padding columns are exactly
    zero by construction (required by the in-kernel roll/slice)."""
    A = action_dim
    assert A <= HEAD_HALF, "action_dim must fit in half the padded head width"
    wh = jnp.zeros((HIDDEN, OUT_LANES), jnp.float32)
    wh = wh.at[:, :A].set(params["wmu"]).at[:, HEAD_HALF:HEAD_HALF + A].set(params["wstd"])
    bh = jnp.zeros((1, OUT_LANES), jnp.float32)
    bh = bh.at[:, :A].set(params["bmu"]).at[:, HEAD_HALF:HEAD_HALF + A].set(params["bstd"])
    return {
        "w1": params["w1"].astype(jnp.bfloat16), "b1": params["b1"],
        "w2": params["w2"].astype(jnp.bfloat16), "b2": params["b2"],
        "wh": wh.astype(jnp.bfloat16), "bh": bh,
    }


def actor_forward(x, eps, prep, max_action):
    """x: [B, state_dim] f32, eps: [B, action_dim] f32 standard-normal noise,
    prep: output of prepare_params().  Returns (action [B, A], log_prob [B, 1])."""
    B, S = x.shape
    A = eps.shape[1]
    assert A <= HEAD_HALF

    # Even batch split: big tiles (amortize per-step overhead), >=2 (up to 4)
    # tiles once B is large enough so the "parallel" grid axis can be sharded
    # across both v7x TensorCores, rounded to a sublane multiple.
    n_tiles = max(pl.cdiv(B, TILE_B_MAX), min(4, max(B // MIN_SPLIT_B, 1)))
    tile_b = _round_up(pl.cdiv(B, n_tiles), 8)
    n_tiles = pl.cdiv(B, tile_b)
    b_pad = n_tiles * tile_b

    if b_pad != B:
        # Ragged tail only: pad with zeros (finite through the whole epilogue).
        x_in = jnp.zeros((b_pad, S), x.dtype).at[:B].set(x)
        eps_in = jnp.zeros((b_pad, A), eps.dtype).at[:B].set(eps)
    else:
        x_in, eps_in = x, eps

    kernel = functools.partial(actor_kernel, action_dim=A,
                               max_action=float(max_action))

    def batch_spec(feat):
        return pl.BlockSpec((tile_b, feat), lambda i: (i, 0))

    def const_spec(shape):
        # Weights total ~0.4 MiB; double-buffering them is negligible here, so
        # pl.Buffered(1) is intentionally omitted to keep lowering maximally safe.
        return pl.BlockSpec(shape, lambda i: (0, 0))

    flops = 2 * b_pad * (S * HIDDEN + HIDDEN * HIDDEN + HIDDEN * OUT_LANES)
    transcendentals = 4 * b_pad * OUT_LANES        # exp, log1p, tanh, log (vreg width)
    bytes_accessed = (b_pad * (4 * S + 4 * A + 4 * A + 4)
                      + 2 * (S * HIDDEN + HIDDEN * HIDDEN + HIDDEN * OUT_LANES)
                      + 4 * (2 * HIDDEN + OUT_LANES))

    action, logp = pl.pallas_call(
        kernel,
        out_shape=(jax.ShapeDtypeStruct((b_pad, A), jnp.float32),
                   jax.ShapeDtypeStruct((b_pad, 1), jnp.float32)),
        grid=(n_tiles,),
        in_specs=[
            batch_spec(S),                    # x (f32, batch-tiled; bf16 cast in-kernel)
            batch_spec(A),                    # eps (f32, natural width, batch-tiled)
            const_spec((S, HIDDEN)),          # w1 (bf16, VMEM-resident)
            const_spec((1, HIDDEN)),          # b1
            const_spec((HIDDEN, HIDDEN)),     # w2
            const_spec((1, HIDDEN)),          # b2
            const_spec((HIDDEN, OUT_LANES)),  # fused head weight
            const_spec((1, OUT_LANES)),       # fused head bias
        ],
        out_specs=(batch_spec(A), batch_spec(1)),
        compiler_params=pltpu.CompilerParams(
            dimension_semantics=("parallel",)),
        cost_estimate=pl.CostEstimate(flops=flops,
                                      transcendentals=transcendentals,
                                      bytes_accessed=bytes_accessed),
    )(x_in, eps_in, prep["w1"], prep["b1"], prep["w2"], prep["b2"],
      prep["wh"], prep["bh"])

    return action[:B], logp[:B]


def actor_reference(x, params, eps, max_action):
    """Pure-JAX reference mirroring the kernel math (bf16 matmuls, f32 rest)."""
    bf = jnp.bfloat16
    h1 = jnp.maximum(jnp.dot(x.astype(bf), params["w1"].astype(bf),
                             preferred_element_type=jnp.float32) + params["b1"], 0.0)
    h2 = jnp.maximum(jnp.dot(h1.astype(bf), params["w2"].astype(bf),
                             preferred_element_type=jnp.float32) + params["b2"], 0.0)
    mu = jnp.dot(h2.astype(bf), params["wmu"].astype(bf),
                 preferred_element_type=jnp.float32) + params["bmu"]
    std = jnp.logaddexp(jnp.dot(h2.astype(bf), params["wstd"].astype(bf),
                                preferred_element_type=jnp.float32) + params["bstd"], 0.0)
    z = mu + std * eps
    log_prob = -0.5 * eps * eps - jnp.log(std) - 0.5 * jnp.log(2.0 * jnp.pi)
    action = jnp.tanh(z)
    log_prob = log_prob - jnp.log(1.0 - action * action + 1e-07)
    return action * max_action, jnp.sum(log_prob, axis=1, keepdims=True)


def init_params(key, state_dim, action_dim):
    """Deterministic synthetic init (uniform, PyTorch-Linear-like scale)."""
    ks = jax.random.split(key, 8)

    def lin(kw, kb, fan_in, fan_out):
        bound = 1.0 / jnp.sqrt(jnp.float32(fan_in))
        w = jax.random.uniform(kw, (fan_in, fan_out), jnp.float32, -bound, bound)
        b = jax.random.uniform(kb, (1, fan_out), jnp.float32, -bound, bound)
        return w, b

    w1, b1 = lin(ks[0], ks[1], state_dim, HIDDEN)
    w2, b2 = lin(ks[2], ks[3], HIDDEN, HIDDEN)
    wmu, bmu = lin(ks[4], ks[5], HIDDEN, action_dim)
    wstd, bstd = lin(ks[6], ks[7], HIDDEN, action_dim)
    return {"w1": w1, "b1": b1, "w2": w2, "b2": b2,
            "wmu": wmu, "bmu": bmu, "wstd": wstd, "bstd": bstd}


if __name__ == "__main__":
    B, STATE_DIM, ACTION_DIM = 2, 8, 4
    MAX_ACTION = 2.0

    key = jax.random.PRNGKey(0)
    k_params, k_x, k_eps = jax.random.split(key, 3)

    params = init_params(k_params, STATE_DIM, ACTION_DIM)
    prep = prepare_params(params, ACTION_DIM)   # one-time prep, hoisted out of forward

    x = jax.random.normal(k_x, (B, STATE_DIM), jnp.float32)
    # rsample noise generated deterministically outside the kernel (reparameterization)
    eps = jax.random.normal(k_eps, (B, ACTION_DIM), jnp.float32)

    action, log_prob = actor_forward(x, eps, prep, MAX_ACTION)
    jax.block_until_ready((action, log_prob))

    assert action.shape == (B, ACTION_DIM)
    assert log_prob.shape == (B, 1)

    ref_action, ref_logp = actor_reference(x, params, eps, MAX_ACTION)
    np.testing.assert_allclose(np.asarray(action), np.asarray(ref_action),
                               rtol=5e-3, atol=5e-3)
    np.testing.assert_allclose(np.asarray(log_prob), np.asarray(ref_logp),
                               rtol=5e-3, atol=5e-3)

    print("KERNEL_OK")
</pallas_src>

<mosaic_0001>
module attributes {stable_mosaic.version = 11 : i64} {
  func.func @actor_kernel(%arg0: i32, %arg1: memref<8x8xf32, #tpu.memory_space<vmem>>, %arg2: memref<8x4xf32, #tpu.memory_space<vmem>>, %arg3: memref<8x256xbf16, #tpu.memory_space<vmem>>, %arg4: memref<1x256xf32, #tpu.memory_space<vmem>>, %arg5: memref<256x256xbf16, #tpu.memory_space<vmem>>, %arg6: memref<1x256xf32, #tpu.memory_space<vmem>>, %arg7: memref<256x128xbf16, #tpu.memory_space<vmem>>, %arg8: memref<1x128xf32, #tpu.memory_space<vmem>>, %arg9: memref<8x4xf32, #tpu.memory_space<vmem>>, %arg10: memref<8x1xf32, #tpu.memory_space<vmem>>) attributes {dimension_semantics = [#tpu.dimension_semantics<parallel>], iteration_bounds = array<i64: 1>, scalar_prefetch = 0 : i64, scratch_operands = 0 : i64, tpu.core_type = #tpu.core_type<tc>, window_params = [{transform_indices = @transform_0, window_bounds = array<i64: 8, 8>}, {transform_indices = @transform_1, window_bounds = array<i64: 8, 4>}, {pipeline_mode = #tpu.pipeline_mode<synchronous>, transform_indices = @transform_2, window_bounds = array<i64: 8, 256>}, {pipeline_mode = #tpu.pipeline_mode<synchronous>, transform_indices = @transform_3, window_bounds = array<i64: 1, 256>}, {pipeline_mode = #tpu.pipeline_mode<synchronous>, transform_indices = @transform_4, window_bounds = array<i64: 256, 256>}, {pipeline_mode = #tpu.pipeline_mode<synchronous>, transform_indices = @transform_5, window_bounds = array<i64: 1, 256>}, {pipeline_mode = #tpu.pipeline_mode<synchronous>, transform_indices = @transform_6, window_bounds = array<i64: 256, 128>}, {pipeline_mode = #tpu.pipeline_mode<synchronous>, transform_indices = @transform_7, window_bounds = array<i64: 1, 128>}, {transform_indices = @transform_8, window_bounds = array<i64: 8, 4>}, {transform_indices = @transform_9, window_bounds = array<i64: 8, 1>}]} {
    %c0 = arith.constant 0 : index
    %c0_0 = arith.constant 0 : index
    %0 = vector.load %arg1[%c0, %c0_0] : memref<8x8xf32, #tpu.memory_space<vmem>>, vector<8x8xf32>
    %1 = arith.truncf %0 : vector<8x8xf32> to vector<8x8xbf16>
    %c0_1 = arith.constant 0 : index
    %c0_2 = arith.constant 0 : index
    %2 = vector.load %arg3[%c0_1, %c0_2] : memref<8x256xbf16, #tpu.memory_space<vmem>>, vector<8x256xbf16>
    %cst = arith.constant dense<0.000000e+00> : vector<8x256xf32>
    %3 = tpu.matmul %1, %2, %cst {dimension_numbers = #tpu.dot_dimension_numbers<[1], [0], [0], [1], [0, 0, 1, 1], [], []>} : vector<8x8xbf16>, vector<8x256xbf16>, vector<8x256xf32> -> vector<8x256xf32>
    %c0_3 = arith.constant 0 : index
    %c0_4 = arith.constant 0 : index
    %4 = vector.load %arg4[%c0_3, %c0_4] : memref<1x256xf32, #tpu.memory_space<vmem>>, vector<1x256xf32>
    %5 = vector.broadcast %4 : vector<1x256xf32> to vector<8x256xf32>
    %6 = arith.addf %3, %5 : vector<8x256xf32>
    %cst_5 = arith.constant 0.000000e+00 : f32
    %7 = vector.broadcast %cst_5 : f32 to vector<8x256xf32>
    %8 = arith.maximumf %6, %7 : vector<8x256xf32>
    %9 = arith.truncf %8 : vector<8x256xf32> to vector<8x256xbf16>
    %c0_6 = arith.constant 0 : index
    %c0_7 = arith.constant 0 : index
    %10 = vector.load %arg5[%c0_6, %c0_7] : memref<256x256xbf16, #tpu.memory_space<vmem>>, vector<256x256xbf16>
    %cst_8 = arith.constant dense<0.000000e+00> : vector<8x256xf32>
    %11 = tpu.matmul %9, %10, %cst_8 {dimension_numbers = #tpu.dot_dimension_numbers<[1], [0], [0], [1], [0, 0, 1, 1], [], []>} : vector<8x256xbf16>, vector<256x256xbf16>, vector<8x256xf32> -> vector<8x256xf32>
    %c0_9 = arith.constant 0 : index
    %c0_10 = arith.constant 0 : index
    %12 = vector.load %arg6[%c0_9, %c0_10] : memref<1x256xf32, #tpu.memory_space<vmem>>, vector<1x256xf32>
    %13 = vector.broadcast %12 : vector<1x256xf32> to vector<8x256xf32>
    %14 = arith.addf %11, %13 : vector<8x256xf32>
    %cst_11 = arith.constant 0.000000e+00 : f32
    %15 = vector.broadcast %cst_11 : f32 to vector<8x256xf32>
    %16 = arith.maximumf %14, %15 : vector<8x256xf32>
    %17 = arith.truncf %16 : vector<8x256xf32> to vector<8x256xbf16>
    %c0_12 = arith.constant 0 : index
    %c0_13 = arith.constant 0 : index
    %18 = vector.load %arg7[%c0_12, %c0_13] : memref<256x128xbf16, #tpu.memory_space<vmem>>, vector<256x128xbf16>
    %cst_14 = arith.constant dense<0.000000e+00> : vector<8x128xf32>
    %19 = tpu.matmul %17, %18, %cst_14 {dimension_numbers = #tpu.dot_dimension_numbers<[1], [0], [0], [1], [0, 0, 1, 1], [], []>} : vector<8x256xbf16>, vector<256x128xbf16>, vector<8x128xf32> -> vector<8x128xf32>
    %c0_15 = arith.constant 0 : index
    %c0_16 = arith.constant 0 : index
    %20 = vector.load %arg8[%c0_15, %c0_16] : memref<1x128xf32, #tpu.memory_space<vmem>>, vector<1x128xf32>
    %21 = vector.broadcast %20 : vector<1x128xf32> to vector<8x128xf32>
    %22 = arith.addf %19, %21 : vector<8x128xf32>
    %23 = vector.extract_strided_slice %22 {offsets = [0, 0], sizes = [8, 4], strides = [1, 1]} : vector<8x128xf32> to vector<8x4xf32>
    %c64_i32 = arith.constant 64 : i32
    %24 = tpu.dynamic_rotate %22 by %c64_i32 dim 1 : vector<8x128xf32>, i32 -> vector<8x128xf32>
    %25 = vector.extract_strided_slice %24 {offsets = [0, 0], sizes = [8, 4], strides = [1, 1]} : vector<8x128xf32> to vector<8x4xf32>
    %cst_17 = arith.constant 0.000000e+00 : f32
    %26 = vector.broadcast %cst_17 : f32 to vector<8x4xf32>
    %27 = arith.maximumf %25, %26 : vector<8x4xf32>
    %28 = vector.broadcast %cst_17 : f32 to vector<8x4xf32>
    %29 = arith.subf %25, %28 : vector<8x4xf32>
    %30 = arith.cmpf one, %29, %29 : vector<8x4xf32>
    %31 = vector.broadcast %cst_17 : f32 to vector<8x4xf32>
    %32 = arith.addf %25, %31 : vector<8x4xf32>
    %33 = math.absf %29 : vector<8x4xf32>
    %cst_18 = arith.constant 0.000000e+00 : f32
    %34 = vector.broadcast %cst_18 : f32 to vector<8x4xf32>
    %35 = arith.subf %34, %33 : vector<8x4xf32>
    %36 = math.exp %35 : vector<8x4xf32>
    %37 = math.log1p %36 : vector<8x4xf32>
    %38 = arith.addf %27, %37 : vector<8x4xf32>
    %39 = arith.select %30, %32, %38 : vector<8x4xi1>, vector<8x4xf32>
    %c0_19 = arith.constant 0 : index
    %c0_20 = arith.constant 0 : index
    %40 = vector.load %arg2[%c0_19, %c0_20] : memref<8x4xf32, #tpu.memory_space<vmem>>, vector<8x4xf32>
    %41 = arith.mulf %39, %40 : vector<8x4xf32>
    %42 = arith.addf %23, %41 : vector<8x4xf32>
    %43 = math.tanh %42 : vector<8x4xf32>
    %44 = arith.mulf %40, %40 : vector<8x4xf32>
    %cst_21 = arith.constant -5.000000e-01 : f32
    %45 = vector.broadcast %cst_21 : f32 to vector<8x4xf32>
    %46 = arith.mulf %45, %44 : vector<8x4xf32>
    %cst_22 = arith.constant 6.28318548 : f32
    %47 = math.log %cst_22 : f32
    %cst_23 = arith.constant 5.000000e-01 : f32
    %48 = arith.mulf %cst_23, %47 : f32
    %49 = vector.broadcast %48 : f32 to vector<8x4xf32>
    %50 = arith.subf %46, %49 : vector<8x4xf32>
    %51 = arith.mulf %43, %43 : vector<8x4xf32>
    %cst_24 = arith.constant 1.000000e+00 : f32
    %52 = vector.broadcast %cst_24 : f32 to vector<8x4xf32>
    %53 = arith.subf %52, %51 : vector<8x4xf32>
    %cst_25 = arith.constant 1.000000e-07 : f32
    %54 = vector.broadcast %cst_25 : f32 to vector<8x4xf32>
    %55 = arith.addf %53, %54 : vector<8x4xf32>
    %56 = arith.mulf %39, %55 : vector<8x4xf32>
    %57 = math.log %56 : vector<8x4xf32>
    %58 = arith.subf %50, %57 : vector<8x4xf32>
    %cst_26 = arith.constant 2.000000e+00 : f32
    %59 = vector.broadcast %cst_26 : f32 to vector<8x4xf32>
    %60 = arith.mulf %43, %59 : vector<8x4xf32>
    %c0_27 = arith.constant 0 : index
    %c0_28 = arith.constant 0 : index
    %61 = vector.load %arg9[%c0_27, %c0_28] : memref<8x4xf32, #tpu.memory_space<vmem>>, vector<8x4xf32>
    tpu.vector_store %arg9[%c0_27, %c0_28], %60 {strides = array<i32>} : memref<8x4xf32, #tpu.memory_space<vmem>>, vector<8x4xf32>,
    %cst_29 = arith.constant dense<0.000000e+00> : vector<8xf32>
    %62 = vector.multi_reduction <add>, %58, %cst_29 [1] : vector<8x4xf32> to vector<8xf32>
    %63 = vector.shape_cast %62 : vector<8xf32> to vector<8x1xf32>
    %c0_30 = arith.constant 0 : index
    %c0_31 = arith.constant 0 : index
    %64 = vector.load %arg10[%c0_30, %c0_31] : memref<8x1xf32, #tpu.memory_space<vmem>>, vector<8x1xf32>
    tpu.vector_store %arg10[%c0_30, %c0_31], %63 {strides = array<i32>} : memref<8x1xf32, #tpu.memory_space<vmem>>, vector<8x1xf32>,
    return
  }
  func.func @transform_0(%arg0: i32) -> (i32, i32) {
    %c0_i32 = arith.constant 0 : i32
    %c0_i32_0 = arith.constant 0 : i32
    return %arg0, %c0_i32 : i32, i32
  }
  func.func @transform_1(%arg0: i32) -> (i32, i32) {
    %c0_i32 = arith.constant 0 : i32
    %c0_i32_0 = arith.constant 0 : i32
    return %arg0, %c0_i32 : i32, i32
  }
  func.func @transform_2(%arg0: i32) -> (i32, i32) {
    %c0_i32 = arith.constant 0 : i32
    %c0_i32_0 = arith.constant 0 : i32
    %c0_i32_1 = arith.constant 0 : i32
    return %c0_i32, %c0_i32_0 : i32, i32
  }
  func.func @transform_3(%arg0: i32) -> (i32, i32) {
    %c0_i32 = arith.constant 0 : i32
    %c0_i32_0 = arith.constant 0 : i32
    %c0_i32_1 = arith.constant 0 : i32
    return %c0_i32, %c0_i32_0 : i32, i32
  }
  func.func @transform_4(%arg0: i32) -> (i32, i32) {
    %c0_i32 = arith.constant 0 : i32
    %c0_i32_0 = arith.constant 0 : i32
    %c0_i32_1 = arith.constant 0 : i32
    return %c0_i32, %c0_i32_0 : i32, i32
  }
  func.func @transform_5(%arg0: i32) -> (i32, i32) {
    %c0_i32 = arith.constant 0 : i32
    %c0_i32_0 = arith.constant 0 : i32
    %c0_i32_1 = arith.constant 0 : i32
    return %c0_i32, %c0_i32_0 : i32, i32
  }
  func.func @transform_6(%arg0: i32) -> (i32, i32) {
    %c0_i32 = arith.constant 0 : i32
    %c0_i32_0 = arith.constant 0 : i32
    %c0_i32_1 = arith.constant 0 : i32
    return %c0_i32, %c0_i32_0 : i32, i32
  }
  func.func @transform_7(%arg0: i32) -> (i32, i32) {
    %c0_i32 = arith.constant 0 : i32
    %c0_i32_0 = arith.constant 0 : i32
    %c0_i32_1 = arith.constant 0 : i32
    return %c0_i32, %c0_i32_0 : i32, i32
  }
  func.func @transform_8(%arg0: i32) -> (i32, i32) {
    %c0_i32 = arith.constant 0 : i32
    %c0_i32_0 = arith.constant 0 : i32
    return %arg0, %c0_i32 : i32, i32
  }
  func.func @transform_9(%arg0: i32) -> (i32, i32) {
    %c0_i32 = arith.constant 0 : i32
    %c0_i32_0 = arith.constant 0 : i32
    return %arg0, %c0_i32 : i32, i32
  }
}

</mosaic_0001>

<bundles_post_ra>
// kernel: tpu_custom_call.1
= control target key start
LH: loop header
LB: loop body
LE: loop exit
PB: predicated region body
PF: predicated region fallthrough
CT: control target
= control target key end

     0   :  { %15 = vsyncpa [#allocation3], 0  ;;  %s936_s0 = inlined_call_operand.vmem [shape: f32[8,8], index: 0, kind: input, shape index: {}]   ;;  %s937_s1 = inlined_call_operand.vmem [shape: f32[8,4], index: 1, kind: input, shape index: {}]   ;;  %s938_s2 = inlined_call_operand.hbm [shape: bf16[8,256], index: 2, kind: input, shape index: {}]   ;;  %s939_s3 = inlined_call_operand.vmem [shape: f32[1,256], index: 3, kind: input, shape index: {}]   ;;  %s940_s4 = inlined_call_operand.hbm [shape: bf16[256,256], index: 4, kind: input, shape index: {}]   ;;  %s941_s5 = inlined_call_operand.vmem [shape: f32[1,256], index: 5, kind: input, shape index: {}]   ;;  %s942_s6 = inlined_call_operand.hbm [shape: bf16[256,128], index: 6, kind: input, shape index: {}]   ;;  %s943_s7 = inlined_call_operand.vmem [shape: f32[1,128], index: 7, kind: input, shape index: {}]   ;;  %s944_s8 = inlined_call_operand.vmem [shape: f32[8,4], index: 8, kind: output, shape index: {0}]   ;;  %s945_s9 = inlined_call_operand.vmem [shape: f32[8,1], index: 9, kind: output, shape index: {1}]  }
   0x1   :  { %16 = vsyncpa [#allocation5], 0  ;;  %s845_s30 = smov [#allocation4]  }
   0x2   :  { %s38_s10 = sshll.u32 %s845_s30, 4  ;;  %s39_s10 = int_to_ptr.vmem [resolvable:$true] %s38_s10 }
   0x3   :  { %s789_s11 = scalar_lea.vmem %s39_s10, 4096  ;;  %p794_p1 = scmp.lt.s32.totalorder %s39_s10, %s39_s10 }
   0x4   :  { %p790_p0 = scmp.ne.s32.totalorder %s39_s10, %s789_s11  ;;  %p795_p2 = scmp.lt.s32.totalorder %s789_s11, %s789_s11 }
   0x6   :  { %p796_p3 = por %p795_p2, %p794_p1 }
   0x8   :  { %p797_p4 = pnand %p796_p3, %p790_p0 }
   0xa   :  { %800 = shalt.err (!%p797_p4)
}
   0xb   :  { %s846_s12 = smov 128   ;;  %s847_s13 = smov 8  }
   0xc   :  { %44 = dma.hbm_to_vmem [thread:$0]  %s940_s4, 4096, %s39_s10, [#allocation5], %s846_s12, %s846_s12, %s847_s13  }
   0xd   :  { %s848_s16 = smov [#allocation2]   ;;  %s849_s18 = smov [#allocation6]  }
   0xe   :  { %s27_s17 = sshll.u32 %s848_s16, 4  ;;  %s52_s19 = sshll.u32 %s849_s18, 4  ;;  %s28_s17 = int_to_ptr.vmem [resolvable:$true] %s27_s17  ;;  %s53_s19 = int_to_ptr.vmem [resolvable:$true] %s52_s19 }
   0xf   :  { %s809_s20 = scalar_lea.vmem %s28_s17, 128  ;;  %p814_p6 = scmp.lt.s32.totalorder %s28_s17, %s28_s17 }
  0x10   :  { %p810_p5 = scmp.ne.s32.totalorder %s28_s17, %s809_s20  ;;  %p815_p7 = scmp.lt.s32.totalorder %s809_s20, %s809_s20 }
  0x12   :  { %p816_p8 = por %p815_p7, %p814_p6 }
  0x14   :  { %p817_p9 = pnand %p816_p8, %p810_p5 }
  0x16   :  { %820 = shalt.err (!%p817_p9)
}
  0x17   :  { %30 = dma.hbm_to_vmem [thread:$0]  %s938_s2, 128, %s28_s17, [#allocation3]  }
  0x18   :  { %s829_s23 = scalar_lea.vmem %s53_s19, 2048  ;;  %p834_p11 = scmp.lt.s32.totalorder %s53_s19, %s53_s19 }
  0x19   :  { %p830_p10 = scmp.ne.s32.totalorder %s53_s19, %s829_s23  ;;  %p835_p12 = scmp.lt.s32.totalorder %s829_s23, %s829_s23 }
  0x1b   :  { %p836_p13 = por %p835_p12, %p834_p11 }
  0x1d   :  { %p837_p0 = pnand %p836_p13, %p830_p10 }
  0x1f   :  { %840 = shalt.err (!%p837_p0)
}
  0x20   :  { %s850_s4 = smov 64   ;;  %s851_s24 = smov 4  }
  0x21   :  { %58 = dma.hbm_to_vmem [thread:$0]  %s942_s6, 2048, %s53_s19, [#allocation5], %s850_s4, %s850_s4, %s851_s24  }
  0x22   :  { %841 = dma.done.wait [#allocation3], 128  }
  0x23   :  { %842 = vsyncadd [#allocation3], 4294967168 }
  0x24   :  { %843 = dma.done.wait [#allocation5], 6144  }
  0x25   :  { %844 = vsyncadd [#allocation5], 4294961152  ;;  %v852_v0 = vmov 0   ;;  %v73_v1 = vld [vmem:[#allocation2] sm:$0xff]  ;;  %vm95_vm0 = vcmask 1043456   ;;  %vm91_vm1 = vcmask 64512   ;;  %v76_v51 = vlaneseq }
  0x26   :  { %134 = vmatprep.mubr.bf16.mxu0 %v852_v0  ;;  %v71_v2 = vld [vmem:[%s936_s0] sm:$0xff]  ;;  %v624_v3 = vcombine.high %v73_v1, %v73_v1  ;;  %v623_v4 = vcombine.low %v73_v1, %v73_v1  ;;  %v712_v7 = vld [vmem:[#allocation4 + $0x64] ss:$8 sps:$4 sm:$0xff]   ;;  %v714_v10 = vld [vmem:[#allocation4 + $0x60] ss:$8 sps:$4 sm:$0xff]   ;;  %vm606_vm4 = vcmask 31744  }
  0x27   :  { %v709_v5 = vld [vmem:[#allocation4 + $0x74] ss:$8 sps:$4 sm:$0xff]   ;;  %v711_v6 = vld [vmem:[#allocation4 + $0x70] ss:$8 sps:$4 sm:$0xff]   ;;  %v72_v9 = vpack.c.bf16 %v71_v2, %v71_v2  ;;  %v718_v13 = vld [vmem:[#allocation4 + $0x44] ss:$8 sps:$4 sm:$0xff]  }
  0x28   :  { %625 = vmatprep.subr.msk.bf16.mxu0 %vm95_vm0, %v624_v3  ;;  %v97_v8 = vsel %vm95_vm0, %v623_v4, 0  ;;  %351 = vmatprep.subr.bf16.mxu1 %v709_v5  ;;  %v715_v11 = vld [vmem:[#allocation4 + $0x54] ss:$8 sps:$4 sm:$0xff]   ;;  %v717_v12 = vld [vmem:[#allocation4 + $0x50] ss:$8 sps:$4 sm:$0xff]   ;;  %v761_v43 = vld [vmem:[#allocation6 + $0x68] sm:$0xff]  }
  0x29   :  { %117 = vmatpush1.bf16.msra.mxu0 %v97_v8  ;;  %352 = vmatpush1.bf16.msra.mxu1 %v711_v6  ;;  %v720_v14 = vld [vmem:[#allocation4 + $0x40] ss:$8 sps:$4 sm:$0xff]   ;;  %v721_v15 = vld [vmem:[#allocation4 + $0x34] ss:$8 sps:$4 sm:$0xff]   ;;  %v723_v16 = vld [vmem:[#allocation4 + $0x30] ss:$8 sps:$4 sm:$0xff]  }
  0x2a   :  { %353 = vmatprep.subr.bf16.mxu1 %v712_v7  ;;  %v724_v17 = vld [vmem:[#allocation4 + $0x24] ss:$8 sps:$4 sm:$0xff]   ;;  %v726_v18 = vld [vmem:[#allocation4 + $0x20] ss:$8 sps:$4 sm:$0xff]   ;;  %v727_v19 = vld [vmem:[#allocation4 + $0x14] ss:$8 sps:$4 sm:$0xff]  }
  0x2b   :  { %v729_v20 = vld [vmem:[#allocation4 + $0x10] ss:$8 sps:$4 sm:$0xff]   ;;  %v730_v21 = vld [vmem:[#allocation4 + $0x4] ss:$8 sps:$4 sm:$0xff]   ;;  %v732_v22 = vld [vmem:[#allocation4] ss:$8 sps:$4 sm:$0xff]  }
  0x2c   :  { %626 = vmatmul.mubr.msk.bf16.vlgmr.msra.gmra.mxu0 %vm91_vm1, %v72_v9  ;;  %v733_v23 = vld [vmem:[#allocation4 + $0xf4] ss:$8 sps:$4 sm:$0xff]   ;;  %v735_v24 = vld [vmem:[#allocation4 + $0xf0] ss:$8 sps:$4 sm:$0xff]   ;;  %v736_v25 = vld [vmem:[#allocation4 + $0xe4] ss:$8 sps:$4 sm:$0xff]  }
  0x2d   :  { %354 = vmatpush1.bf16.msra.mxu1 %v714_v10  ;;  %v738_v26 = vld [vmem:[#allocation4 + $0xe0] ss:$8 sps:$4 sm:$0xff]   ;;  %v739_v27 = vld [vmem:[#allocation4 + $0xd4] ss:$8 sps:$4 sm:$0xff]   ;;  %v741_v28 = vld [vmem:[#allocation4 + $0xd0] ss:$8 sps:$4 sm:$0xff]  }
  0x2e   :  { %355 = vmatprep.subr.bf16.mxu1 %v715_v11  ;;  %v742_v29 = vld [vmem:[#allocation4 + $0xc4] ss:$8 sps:$4 sm:$0xff]   ;;  %v744_v30 = vld [vmem:[#allocation4 + $0xc0] ss:$8 sps:$4 sm:$0xff]   ;;  %v745_v31 = vld [vmem:[#allocation4 + $0xb4] ss:$8 sps:$4 sm:$0xff]  }
  0x2f   :  { %v747_v32 = vld [vmem:[#allocation4 + $0xb0] ss:$8 sps:$4 sm:$0xff]   ;;  %v748_v33 = vld [vmem:[#allocation4 + $0xa4] ss:$8 sps:$4 sm:$0xff]   ;;  %v750_v34 = vld [vmem:[#allocation4 + $0xa0] ss:$8 sps:$4 sm:$0xff]  }
  0x30   :  { %v751_v35 = vld [vmem:[#allocation4 + $0x94] ss:$8 sps:$4 sm:$0xff]   ;;  %v753_v36 = vld [vmem:[#allocation4 + $0x90] ss:$8 sps:$4 sm:$0xff]   ;;  %v754_v37 = vld [vmem:[#allocation4 + $0x84] ss:$8 sps:$4 sm:$0xff]  }
  0x31   :  { %356 = vmatpush1.bf16.msra.mxu1 %v717_v12  ;;  %v756_v38 = vld [vmem:[#allocation4 + $0x80] ss:$8 sps:$4 sm:$0xff]   ;;  %v757_v39 = vld [vmem:[#allocation6 + $0x78] sm:$0xff]   ;;  %v759_v41 = vld [vmem:[#allocation6 + $0x70] sm:$0xff]   ;;  %v77_v52 = vshrl.u32 %v76_v51, 7  ;;  %vm611_vm5 = vcmask 7168  }
  0x32   :  { %357 = vmatprep.subr.bf16.mxu1 %v718_v13  ;;  %v758_v40 = vld [vmem:[#allocation6 + $0x38] sm:$0xff]   ;;  %677 = vmatprep.subr.bf16.mxu0 %v757_v39  ;;  %v760_v42 = vld [vmem:[#allocation6 + $0x30] sm:$0xff]   ;;  %v762_v44 = vld [vmem:[#allocation6 + $0x28] sm:$0xff]  }
  0x33   :  { %678 = vmatpush3.bf16.msra.mxu0 %v758_v40  ;;  %v763_v45 = vld [vmem:[#allocation6 + $0x60] sm:$0xff]   ;;  %v765_v47 = vld [vmem:[#allocation6 + $0x58] sm:$0xff]   ;;  %v767_v49 = vld [vmem:[#allocation6 + $0x50] sm:$0xff]   ;;  %v78_v53 = vsub.s32 0, %v77_v52  ;;  %v82_v55 = vsub.s32 1, %v77_v52 }
  0x34   :  { %679 = vmatprep.subr.bf16.mxu0 %v759_v41  ;;  %v764_v46 = vld [vmem:[#allocation6 + $0x20] sm:$0xff]   ;;  %v766_v48 = vld [vmem:[#allocation6 + $0x18] sm:$0xff]   ;;  %v768_v50 = vld [vmem:[#allocation6 + $0x10] sm:$0xff]  }
  0x35   :  { %358 = vmatpush1.bf16.msra.mxu1 %v720_v14  ;;  %v74_v54 = vld [vmem:[%s939_s3] sm:$0x3]  ;;  %v769_v4 = vld [vmem:[#allocation6 + $0x48] sm:$0xff]   ;;  %v771_v6 = vld [vmem:[#allocation6 + $0x40] sm:$0xff]  }
  0x36   :  { %359 = vmatprep.subr.bf16.mxu1 %v721_v15  ;;  %v79_v56 = vrot.slane %v74_v54, %v78_v53  ;;  %v83_v57 = vrot.slane %v74_v54, %v82_v55  ;;  %v770_v5 = vld [vmem:[#allocation6 + $0x8] sm:$0xff]   ;;  %v772_v7 = vld [vmem:[#allocation6] sm:$0xff]   ;;  %v179_v8 = vld [vmem:[%s941_s5] sm:$0x3] }
  0x37   :  { %680 = vmatpush3.bf16.msra.mxu0 %v760_v42  ;;  %v184_v9 = vrot.slane %v179_v8, %v78_v53  ;;  %v188_v10 = vrot.slane %v179_v8, %v82_v55 }
  0x38   :  { %681 = vmatprep.subr.bf16.mxu0 %v761_v43  ;;  %v591_v43 = vld [vmem:[%s937_s1] sm:$0xff] }
  0x39   :  { %360 = vmatpush1.bf16.msra.mxu1 %v723_v16  ;;  %v595_v53 = vmul.f32 %v591_v43, %v591_v43 }
  0x3a   :  { %361 = vmatprep.subr.bf16.mxu1 %v724_v17 }
  0x3b   :  { %682 = vmatpush3.bf16.msra.mxu0 %v762_v44  ;;  %v596_v54 = vmul.f32 -0.5, %v595_v53 }
  0x3c   :  { %683 = vmatprep.subr.bf16.mxu0 %v763_v45 }
  0x3d   :  { %362 = vmatpush1.bf16.msra.mxu1 %v726_v18  ;;  %v676_v55 = vadd.f32 -0.9189385, %v596_v54 }
  0x3e   :  { %363 = vmatprep.subr.bf16.mxu1 %v727_v19 }
  0x3f   :  { %684 = vmatpush3.bf16.msra.mxu0 %v764_v46 }
  0x40   :  { %685 = vmatprep.subr.bf16.mxu0 %v765_v47 }
  0x41   :  { %364 = vmatpush1.bf16.msra.mxu1 %v729_v20 }
  0x42   :  { %365 = vmatprep.subr.bf16.mxu1 %v730_v21 }
  0x43   :  { %686 = vmatpush3.bf16.msra.mxu0 %v766_v48 }
  0x44   :  { %687 = vmatprep.subr.bf16.mxu0 %v767_v49 }
  0x45   :  { %366 = vmatpush1.bf16.msra.mxu1 %v732_v22 }
  0x46   :  { %367 = vmatprep.subr.bf16.mxu1 %v733_v23  ;;  %v659_v23 = vld [vmem:[%s943_s7] ss:$0 sm:$0xff] }
  0x47   :  { %688 = vmatpush3.bf16.msra.mxu0 %v768_v50 }
  0x48   :  { %689 = vmatprep.subr.bf16.mxu0 %v769_v4 }
  0x49   :  { %368 = vmatpush2.bf16.msra.mxu1 %v735_v24 }
  0x4a   :  { %369 = vmatprep.subr.bf16.mxu1 %v736_v25 }
  0x4b   :  { %690 = vmatpush3.bf16.msra.mxu0 %v770_v5 }
  0x4c   :  { %691 = vmatprep.subr.bf16.mxu0 %v771_v6 }
  0x4d   :  { %370 = vmatpush2.bf16.msra.mxu1 %v738_v26 }
  0x4e   :  { %371 = vmatprep.subr.bf16.mxu1 %v739_v27 }
  0x4f   :  { %692 = vmatpush3.bf16.msra.mxu0 %v772_v7 }
  0x51   :  { %372 = vmatpush2.bf16.msra.mxu1 %v741_v28 }
  0x52   :  { %373 = vmatprep.subr.bf16.mxu1 %v742_v29 }
  0x55   :  { %374 = vmatpush2.bf16.msra.mxu1 %v744_v30 }
  0x56   :  { %375 = vmatprep.subr.bf16.mxu1 %v745_v31 }
  0x59   :  { %376 = vmatpush2.bf16.msra.mxu1 %v747_v32 }
  0x5a   :  { %377 = vmatprep.subr.bf16.mxu1 %v748_v33 }
  0x5d   :  { %378 = vmatpush2.bf16.msra.mxu1 %v750_v34 }
  0x5e   :  { %379 = vmatprep.subr.bf16.mxu1 %v751_v35 }
  0x61   :  { %380 = vmatpush2.bf16.msra.mxu1 %v753_v36 }
  0x62   :  { %381 = vmatprep.subr.bf16.mxu1 %v754_v37 }
  0x65   :  { %382 = vmatpush2.bf16.msra.mxu1 %v756_v38 }
  0xec   :  { %v136_v58 = vpop.f32.mrf.mxu0 }
  0xed   :  { %v137_v59 = vadd.f32 %v136_v58, %v79_v56 }
  0xee   :  { %v138_v60 = vpop.f32.mrf.mxu0 }
  0xef   :  { %v139_v61 = vadd.f32 %v138_v60, %v83_v57  ;;  %v143_v62 = vmax.f32 %v137_v59, 0.0 }
  0xf0   :  { %v140_v63 = vpop.f32.mrf.mxu0 }
  0xf1   :  { %v144_v0 = vmax.f32 %v139_v61, 0.0  ;;  %v145_v3 = vpack.c.bf16 %v143_v62, %v143_v62 }
  0xf2   :  { %v141_v1 = vpop.f32.mrf.mxu0 }
  0xf3   :  { %v146_v2 = vpack.c.bf16 %v144_v0, %v144_v0 }
  0xf5   :  { %383 = vmatprep.mubr.bf16.mxu1 %v146_v2 }
  0xf6   :  { %384 = vmatmul.mubr.bf16.vlgmr.msra.gmra.mxu1 %v145_v3 }
 0x1b6   :  { %v385_v11 = vpop.f32.mrf.mxu1 }
 0x1b7   :  { %v386_v12 = vadd.f32 %v385_v11, %v184_v9 }
 0x1b8   :  { %v387_v13 = vpop.f32.mrf.mxu1 }
 0x1b9   :  { %v388_v14 = vadd.f32 %v387_v13, %v188_v10  ;;  %v392_v15 = vmax.f32 %v386_v12, 0.0 }
 0x1ba   :  { %v389_v16 = vpop.f32.mrf.mxu1 }
 0x1bb   :  { %v393_v17 = vmax.f32 %v388_v14, 0.0  ;;  %v394_v20 = vpack.c.bf16 %v392_v15, %v392_v15 }
 0x1bc   :  { %v390_v18 = vpop.f32.mrf.mxu1 }
 0x1bd   :  { %v395_v19 = vpack.c.bf16 %v393_v17, %v393_v17 }
 0x1bf   :  { %563 = vmatprep.mubr.bf16.mxu0 %v395_v19 }
 0x1c0   :  { %564 = vmatmul.mubr.bf16.vlgmr.msra.gmra.mxu0 %v394_v20 }
 0x280   :  { %v693_v21 = vpop.f32.mrf.mxu0 }
 0x282   :  { %v694_v22 = vpop.f32.mrf.mxu0 }
 0x283   :  { %v695_v24 = vadd.f32 %v694_v22, %v693_v21 }
 0x284   :  { %v696_v25 = vpop.f32.mrf.mxu0 }
 0x285   :  { %v566_v26 = vadd.f32 %v695_v24, %v659_v23 }
 0x286   :  { %v697_v27 = vpop.f32.mrf.mxu0 }
 0x287   :  { %571 = vrot.lane.b32.xlu0 %v566_v26, %s850_s4 }
 0x2f9   :  { %v572_v28 = vpop.permute.xlu0 %571 }
 0x2fa   :  { %v576_v29 = vand.u32 2147483647, %v572_v28  ;;  %v573_v40 = vmax.f32 %v572_v28, 0.0  ;;  %vm574_vm3 = vcmp.ne.f32.partialorder %v572_v28, %v572_v28 }
 0x2fc   :  { %v577_v30 = vsub.f32 0.0, %v576_v29 }
 0x2fe   :  { %v578_v31 = vmul.f32 1.442695, %v577_v30 }
 0x300   :  { %773 = vpow2.f32 %v578_v31 }
 0x30d   :  { %v774_v32 = vpop.eup %773 }
 0x30e   :  { %v580_v33 = vadd.f32 1.0, %v774_v32  ;;  %v583_v34 = vmul.f32 -0.5, %v774_v32  ;;  %v586_v36 = vand.u32 2147483647, %v774_v32 }
 0x310   :  { %775 = vlog2.f32 %v580_v33  ;;  %v584_v35 = vadd.f32 1.0, %v583_v34  ;;  %vm587_vm2 = vcmp.lt.f32.partialorder %v586_v36, 0.0004427343 }
 0x312   :  { %v585_v39 = vmul.f32 %v774_v32, %v584_v35 }
 0x31d   :  { %v776_v37 = vpop.eup %775 }
 0x31e   :  { %v582_v38 = vmul.f32 0.6931472, %v776_v37 }
 0x320   :  { %v588_v41 = vsel %vm587_vm2, %v585_v39, %v582_v38 }
 0x321   :  { %v589_v42 = vadd.f32 %v588_v41, %v573_v40 }
 0x323   :  { %v590_v44 = vsel %vm574_vm3, %v572_v28, %v589_v42 }
 0x324   :  { %v592_v45 = vmul.f32 %v591_v43, %v590_v44 }
 0x326   :  { %v593_v46 = vadd.f32 %v592_v45, %v566_v26 }
 0x328   :  { %777 = vtanh.f32 %v593_v46 }
 0x335   :  { %v778_v47 = vpop.eup %777 }
 0x336   :  { %v598_v48 = vmul.f32 %v778_v47, %v778_v47  ;;  %v605_v49 = vmul.f32 2.0, %v778_v47 }
 0x338   :  { %v599_v50 = vsub.f32 1.0, %v598_v48  ;;  %607 = vst.msk [vmem:[%s944_s8] sm:$0xff] %vm606_vm4, %v605_v49 }
 0x33a   :  { %v600_v51 = vadd.f32 1e-07, %v599_v50 }
 0x33c   :  { %v601_v52 = vmul.f32 %v600_v51, %v590_v44 }
 0x33e   :  { %779 = vlog2.f32 %v601_v52 }
 0x34b   :  { %v780_v56 = vpop.eup %779 }
 0x34c   :  { %v603_v57 = vmul.f32 0.6931472, %v780_v56 }
 0x34e   :  { %v604_v58 = vsub.f32 %v676_v55, %v603_v57 }
 0x350   :  { %v608_v59 = vsel %vm606_vm4, %v604_v58, 0.0 }
 0x351   :  { %609 = vadd.xlane.f32.xlu0 %v608_v59 }
 0x3da   :  { %v610_v60 = vpop.xlane.xlu0 %609 }
 0x3db   :  { %612 = vst.msk [vmem:[%s945_s9] sm:$0xff] %vm611_vm5, %v610_v60 }
 0x3dc   :  { %621 = vsyncpa [#allocation3], 1 }
 0x3dd   :  { %622 = vsyncpa [#allocation5], 1 }

</bundles_post_ra>
